<compile_context>
chip_gen: v7x
topology: tpu7x:2x2x1
jax: 0.10.0
libtpu: 0.0.40
codegen_flags: <defaults>
</compile_context>

<pallas_src>
import functools

import jax
import jax.numpy as jnp
from jax.experimental import pallas as pl
from jax.experimental.pallas import tpu as pltpu


def _pad_kernel(x_ref, o_ref, *, pady: int, padx: int):
    # x_ref block: (cb, H, W); o_ref block: (cb, H + 2*pady, W + 2*padx)
    Cb, H, W = x_ref.shape
    Ho = H + 2 * pady

    x = x_ref[...]  # (cb, H, W) — loaded once, reused for interior + top band

    # Interior: original plane offset by (pady, padx). pady/padx are Python
    # ints, so all slices below are static.
    o_ref[:, pady:pady + H, padx:padx + W] = x

    if pady > 0:
        # Replicate-pad: top `pady` rows copy input row 0.
        o_ref[:, 0:pady, padx:padx + W] = jnp.broadcast_to(
            x[:, 0:1, :], (Cb, pady, W))
        # Constant-pad: bottom `pady` rows are zero.
        o_ref[:, pady + H:Ho, padx:padx + W] = jnp.zeros(
            (Cb, pady, W), o_ref.dtype)

    if padx > 0:
        # Constant-pad: left / right `padx` columns are zero (full height).
        zcol = jnp.zeros((Cb, Ho, padx), o_ref.dtype)
        o_ref[:, :, 0:padx] = zcol
        o_ref[:, :, padx + W:] = zcol


def _pick_channel_block(nc, h, w, ho, wo, itemsize, budget_bytes):
    """Largest #planes per block whose double-buffered (in+out) bytes fit budget."""
    per_plane = (h * w + ho * wo) * itemsize
    max_cb = max(1, budget_bytes // (2 * per_plane))  # x2 for double buffering
    return int(min(nc, max_cb))


def custom_pad_layer(x: jax.Array, kernel_size=(3, 3)) -> jax.Array:
    """JAX/Pallas equivalent of _Custom_pad_layer(kernel_size)(x), NCHW layout."""
    padx = int((kernel_size[1] - 1) / 2)
    pady = int((kernel_size[0] - 1) / 2)

    N, C, H, W = x.shape
    Ho, Wo = H + 2 * pady, W + 2 * padx
    NC = N * C
    itemsize = jnp.dtype(x.dtype).itemsize

    # Block over fused (N*C) channel axis; keep double-buffered VMEM usage
    # <= ~32 MiB so it works on v7x's 64 MiB VMEM with headroom.
    cb = _pick_channel_block(NC, H, W, Ho, Wo, itemsize, budget_bytes=32 << 20)

    # Contiguous reshape: free in XLA, lets one grid step cover many planes.
    x_flat = x.reshape(NC, H, W)

    kernel = functools.partial(_pad_kernel, pady=pady, padx=padx)
    bytes_accessed = (NC * H * W + NC * Ho * Wo) * itemsize

    out_flat = pl.pallas_call(
        kernel,
        out_shape=jax.ShapeDtypeStruct((NC, Ho, Wo), x.dtype),
        grid=(pl.cdiv(NC, cb),),
        # Last two dims of the block equal the full array dims, so the
        # (8, 128) divisibility constraint does not apply.
        in_specs=[pl.BlockSpec((cb, H, W), lambda i: (i, 0, 0))],
        out_specs=pl.BlockSpec((cb, Ho, Wo), lambda i: (i, 0, 0)),
        compiler_params=pltpu.CompilerParams(
            dimension_semantics=("parallel",),
            vmem_limit_bytes=48 << 20,  # safe on v7x (64 MiB) and v5e/v6e
        ),
        cost_estimate=pl.CostEstimate(
            flops=0, transcendentals=0, bytes_accessed=bytes_accessed),
    )(x_flat)

    return out_flat.reshape(N, C, Ho, Wo)


def _reference(x: jax.Array, kernel_size=(3, 3)) -> jax.Array:
    """Pure-JAX reference reproducing the two F.pad calls."""
    padx = int((kernel_size[1] - 1) / 2)
    pady = int((kernel_size[0] - 1) / 2)
    # replicate pad: top of H by pady
    x = jnp.pad(x, ((0, 0), (0, 0), (pady, 0), (0, 0)), mode="edge")
    # constant pad: bottom of H by pady, W left/right by padx
    x = jnp.pad(x, ((0, 0), (0, 0), (0, pady), (padx, padx)), mode="constant")
    return x


if __name__ == "__main__":
    key = jax.random.PRNGKey(0)
    N, C, H, W = 2, 4, 16, 16
    kernel_size = (3, 3)  # -> padx = pady = 1, output (2, 4, 18, 18)

    x = jax.random.normal(key, (N, C, H, W), dtype=jnp.float32)

    out = custom_pad_layer(x, kernel_size)
    out = jax.block_until_ready(out)

    ref = _reference(x, kernel_size)
    assert out.shape == ref.shape, (out.shape, ref.shape)
    # Pure pad/copy must be bit-exact.
    assert bool(jnp.array_equal(out, ref)), "Pallas pad output mismatch vs reference"

    print("KERNEL_OK")
</pallas_src>

<mosaic_0001>
module attributes {stable_mosaic.version = 11 : i64} {
  func.func @_pad_kernel(%arg0: i32, %arg1: memref<8x16x16xf32, #tpu.memory_space<vmem>>, %arg2: memref<8x18x18xf32, #tpu.memory_space<vmem>>) attributes {dimension_semantics = [#tpu.dimension_semantics<parallel>], iteration_bounds = array<i64: 1>, scalar_prefetch = 0 : i64, scratch_operands = 0 : i64, tpu.core_type = #tpu.core_type<tc>, window_params = [{transform_indices = @transform_0, window_bounds = array<i64: 8, 16, 16>}, {transform_indices = @transform_1, window_bounds = array<i64: 8, 18, 18>}]} {
    %c0 = arith.constant 0 : index
    %c0_0 = arith.constant 0 : index
    %c0_1 = arith.constant 0 : index
    %0 = vector.load %arg1[%c0, %c0_0, %c0_1] : memref<8x16x16xf32, #tpu.memory_space<vmem>>, vector<8x16x16xf32>
    %c0_2 = arith.constant 0 : index
    %c1 = arith.constant 1 : index
    %c1_3 = arith.constant 1 : index
    %1 = vector.load %arg2[%c0_2, %c1, %c1_3] : memref<8x18x18xf32, #tpu.memory_space<vmem>>, vector<8x16x16xf32>
    tpu.vector_store %arg2[%c0_2, %c1, %c1_3], %0 {strides = array<i32>} : memref<8x18x18xf32, #tpu.memory_space<vmem>>, vector<8x16x16xf32>,
    %2 = vector.extract_strided_slice %0 {offsets = [0, 0, 0], sizes = [8, 1, 16], strides = [1, 1, 1]} : vector<8x16x16xf32> to vector<8x1x16xf32>
    %c0_4 = arith.constant 0 : index
    %c0_5 = arith.constant 0 : index
    %c1_6 = arith.constant 1 : index
    %3 = vector.load %arg2[%c0_4, %c0_5, %c1_6] : memref<8x18x18xf32, #tpu.memory_space<vmem>>, vector<8x1x16xf32>
    tpu.vector_store %arg2[%c0_4, %c0_5, %c1_6], %2 {strides = array<i32>} : memref<8x18x18xf32, #tpu.memory_space<vmem>>, vector<8x1x16xf32>,
    %cst = arith.constant 0.000000e+00 : f32
    %4 = vector.broadcast %cst : f32 to vector<8x1x16xf32>
    %c0_7 = arith.constant 0 : index
    %c17 = arith.constant 17 : index
    %c1_8 = arith.constant 1 : index
    %5 = vector.load %arg2[%c0_7, %c17, %c1_8] : memref<8x18x18xf32, #tpu.memory_space<vmem>>, vector<8x1x16xf32>
    tpu.vector_store %arg2[%c0_7, %c17, %c1_8], %4 {strides = array<i32>} : memref<8x18x18xf32, #tpu.memory_space<vmem>>, vector<8x1x16xf32>,
    %cst_9 = arith.constant 0.000000e+00 : f32
    %6 = vector.broadcast %cst_9 : f32 to vector<8x18x1xf32>
    %c0_10 = arith.constant 0 : index
    %c0_11 = arith.constant 0 : index
    %c0_12 = arith.constant 0 : index
    %7 = vector.load %arg2[%c0_10, %c0_11, %c0_12] : memref<8x18x18xf32, #tpu.memory_space<vmem>>, vector<8x18x1xf32>
    tpu.vector_store %arg2[%c0_10, %c0_11, %c0_12], %6 {strides = array<i32>} : memref<8x18x18xf32, #tpu.memory_space<vmem>>, vector<8x18x1xf32>,
    %c0_13 = arith.constant 0 : index
    %c0_14 = arith.constant 0 : index
    %c17_15 = arith.constant 17 : index
    %8 = vector.load %arg2[%c0_13, %c0_14, %c17_15] : memref<8x18x18xf32, #tpu.memory_space<vmem>>, vector<8x18x1xf32>
    tpu.vector_store %arg2[%c0_13, %c0_14, %c17_15], %6 {strides = array<i32>} : memref<8x18x18xf32, #tpu.memory_space<vmem>>, vector<8x18x1xf32>,
    return
  }
  func.func @transform_0(%arg0: i32) -> (i32, i32, i32) {
    %c0_i32 = arith.constant 0 : i32
    %c0_i32_0 = arith.constant 0 : i32
    %c0_i32_1 = arith.constant 0 : i32
    return %arg0, %c0_i32, %c0_i32_0 : i32, i32, i32
  }
  func.func @transform_1(%arg0: i32) -> (i32, i32, i32) {
    %c0_i32 = arith.constant 0 : i32
    %c0_i32_0 = arith.constant 0 : i32
    %c0_i32_1 = arith.constant 0 : i32
    return %arg0, %c0_i32, %c0_i32_0 : i32, i32, i32
  }
}

</mosaic_0001>

<bundles_post_ra>
// kernel: tpu_custom_call.1
= control target key start
LH: loop header
LB: loop body
LE: loop exit
PB: predicated region body
PF: predicated region fallthrough
CT: control target
= control target key end

     0   :  { %6 = vsyncpa [#allocation3], 0  ;;  %s222_s6 = smov [#allocation2]   ;;  %s625_s0 = inlined_call_operand.hbm [shape: f32[8,16,16], index: 0, kind: input, shape index: {}]   ;;  %s626_s1 = inlined_call_operand.vmem [shape: f32[8,18,18], index: 1, kind: output, shape index: {}]  }
   0x1   :  { %s12_s7 = sshll.u32 %s222_s6, 4  ;;  %s198_s10 = scalar_lea.hbm %s625_s0, 2048  ;;  %s13_s7 = int_to_ptr.vmem [resolvable:$true] %s12_s7 }
   0x2   :  { %p199_p0 = scmp.ne.s32.totalorder %s625_s0, %s198_s10  ;;  %p202_p1 = scmp.lt.u32.totalorder %s198_s10, %s625_s0 }
   0x4   :  { %p204_p2 = pnand %p202_p1, %p199_p0 }
   0x6   :  { %207 = shalt.err (!%p204_p2)
}
   0x7   :  { %s208_s15 = scalar_lea.vmem %s13_s7, 2048  ;;  %p213_p4 = scmp.lt.s32.totalorder %s13_s7, %s13_s7 }
   0x8   :  { %p209_p3 = scmp.ne.s32.totalorder %s13_s7, %s208_s15  ;;  %p214_p5 = scmp.lt.s32.totalorder %s208_s15, %s208_s15 }
   0xa   :  { %p215_p6 = por %p214_p5, %p213_p4 }
   0xc   :  { %p216_p7 = pnand %p215_p6, %p209_p3 }
   0xe   :  { %219 = shalt.err (!%p216_p7)
}
   0xf   :  { %s223_s16 = smov 128   ;;  %s224_s17 = smov 8  }
  0x10   :  { %18 = dma.hbm_to_vmem [thread:$0]  %s625_s0, 2048, %s13_s7, [#allocation3], %s223_s16, %s223_s16, %s224_s17  }
  0x11   :  { %220 = dma.done.wait [#allocation3], 2048  }
  0x12   :  { %221 = vsyncadd [#allocation3], 4294965248  ;;  %vm119_vm0 = vcmask 131080   ;;  %v225_v0 = vmov 0.0   ;;  %v24_v1 = vld [vmem:[#allocation2 + $0x10] sm:$0xff]  ;;  %v22_v2 = vld [vmem:[#allocation2] sm:$0xff] }
  0x13   :  { %128 = vst.msk [vmem:[%s626_s1 + $0x11] sm:$0x1] %vm119_vm0, %v225_v0  ;;  %129 = vst.msk [vmem:[%s626_s1 + $0x29] sm:$0x1] %vm119_vm0, %v225_v0  ;;  %s226_s6 = smov 1   ;;  %v25_v3 = vld [vmem:[#allocation2 + $0x18] sm:$0xff] }
  0x14   :  { %130 = vst.msk [vmem:[%s626_s1 + $0x41] sm:$0x1] %vm119_vm0, %v225_v0  ;;  %131 = vst.msk [vmem:[%s626_s1 + $0x59] sm:$0x1] %vm119_vm0, %v225_v0  ;;  %58 = vrot.lane.b32.xlu1 %v24_v1, %s226_s6  ;;  %54 = vrot.lane.b32.xlu0 %v22_v2, %s226_s6  ;;  %v23_v4 = vld [vmem:[#allocation2 + $0x8] sm:$0xff]  ;;  %v26_v6 = vld [vmem:[#allocation2 + $0x20] sm:$0xff] }
  0x15   :  { %132 = vst.msk [vmem:[%s626_s1 + $0x71] sm:$0x1] %vm119_vm0, %v225_v0  ;;  %133 = vst.msk [vmem:[%s626_s1 + $0x89] sm:$0x1] %vm119_vm0, %v225_v0  ;;  %v27_v5 = vld [vmem:[#allocation2 + $0x28] sm:$0xff]  ;;  %v29_v7 = vld [vmem:[#allocation2 + $0x38] sm:$0xff] }
  0x16   :  { %134 = vst.msk [vmem:[%s626_s1 + $0xa1] sm:$0x1] %vm119_vm0, %v225_v0  ;;  %135 = vst.msk [vmem:[%s626_s1 + $0xb9] sm:$0x1] %vm119_vm0, %v225_v0  ;;  %v28_v8 = vld [vmem:[#allocation2 + $0x30] sm:$0xff]  ;;  %v31_v9 = vld [vmem:[#allocation2 + $0x48] sm:$0xff] }
  0x17   :  { %v30_v10 = vld [vmem:[#allocation2 + $0x40] sm:$0xff]  ;;  %v33_v11 = vld [vmem:[#allocation2 + $0x58] sm:$0xff]  ;;  %v32_v12 = vld [vmem:[#allocation2 + $0x50] sm:$0xff]  ;;  %vm102_vm1 = vcmask 138248   ;;  %vm136_vm2 = vcmask 7168   ;;  %vm162_vm3 = vcmask 146568  }
  0x18   :  { %60 = vrot.lane.b32.xlu1 %v25_v3, %s226_s6  ;;  %56 = vrot.lane.b32.xlu0 %v23_v4, %s226_s6  ;;  %v35_v13 = vld [vmem:[#allocation2 + $0x68] sm:$0xff]  ;;  %v34_v14 = vld [vmem:[#allocation2 + $0x60] sm:$0xff]  ;;  %v37_v15 = vld [vmem:[#allocation2 + $0x78] sm:$0xff]  ;;  %vm139_vm4 = vcmask 1024   ;;  %vm165_vm5 = vcmask 140424  }
  0x19   :  { %v36_v16 = vld [vmem:[#allocation2 + $0x70] sm:$0xff] }
  0x1c   :  { %64 = vrot.lane.b32.xlu1 %v27_v5, %s226_s6  ;;  %62 = vrot.lane.b32.xlu0 %v26_v6, %s226_s6 }
  0x20   :  { %68 = vrot.lane.b32.xlu1 %v29_v7, %s226_s6  ;;  %66 = vrot.lane.b32.xlu0 %v28_v8, %s226_s6 }
  0x24   :  { %72 = vrot.lane.b32.xlu1 %v31_v9, %s226_s6  ;;  %70 = vrot.lane.b32.xlu0 %v30_v10, %s226_s6 }
  0x28   :  { %76 = vrot.lane.b32.xlu1 %v33_v11, %s226_s6  ;;  %74 = vrot.lane.b32.xlu0 %v32_v12, %s226_s6 }
  0x2c   :  { %80 = vrot.lane.b32.xlu1 %v35_v13, %s226_s6  ;;  %78 = vrot.lane.b32.xlu0 %v34_v14, %s226_s6 }
  0x30   :  { %84 = vrot.lane.b32.xlu1 %v37_v15, %s226_s6  ;;  %82 = vrot.lane.b32.xlu0 %v36_v16, %s226_s6 }
  0x86   :  { %v59_v17 = vpop.permute.xlu1 %58  ;;  %v55_v18 = vpop.permute.xlu0 %54 }
  0x87   :  { %105 = vst.msk [vmem:[%s626_s1 + $0x19] sm:$0xff] %vm102_vm1, %v59_v17  ;;  %103 = vst.msk [vmem:[%s626_s1 + $0x1] sm:$0xff] %vm102_vm1, %v55_v18 }
  0x88   :  { %121 = vst.msk [vmem:[%s626_s1 + $0x18] sm:$0x1] %vm119_vm0, %v59_v17  ;;  %120 = vst.msk [vmem:[%s626_s1] sm:$0x1] %vm119_vm0, %v55_v18 }
  0x89   :  { %141 = vst.msk [vmem:[%s626_s1 + $0x18] sm:$0xff] %vm136_vm2, %v225_v0  ;;  %137 = vst.msk [vmem:[%s626_s1] sm:$0xff] %vm136_vm2, %v225_v0 }
  0x8a   :  { %167 = vst.msk [vmem:[%s626_s1 + $0x18] sm:$0xff] %vm162_vm3, %v225_v0  ;;  %163 = vst.msk [vmem:[%s626_s1] sm:$0xff] %vm162_vm3, %v225_v0  ;;  %v61_v19 = vpop.permute.xlu1 %60  ;;  %v57_v20 = vpop.permute.xlu0 %56 }
  0x8b   :  { %106 = vst.msk [vmem:[%s626_s1 + $0x21] sm:$0xff] %vm102_vm1, %v61_v19  ;;  %104 = vst.msk [vmem:[%s626_s1 + $0x9] sm:$0xff] %vm102_vm1, %v57_v20 }
  0x8c   :  { %142 = vst.msk [vmem:[%s626_s1 + $0x20] sm:$0xff] %vm136_vm2, %v225_v0  ;;  %138 = vst.msk [vmem:[%s626_s1 + $0x8] sm:$0xff] %vm136_vm2, %v225_v0 }
  0x8d   :  { %143 = vst.msk [vmem:[%s626_s1 + $0x28] sm:$0x3] %vm139_vm4, %v225_v0  ;;  %140 = vst.msk [vmem:[%s626_s1 + $0x10] sm:$0x3] %vm139_vm4, %v225_v0 }
  0x8e   :  { %168 = vst.msk [vmem:[%s626_s1 + $0x20] sm:$0xff] %vm162_vm3, %v225_v0  ;;  %164 = vst.msk [vmem:[%s626_s1 + $0x8] sm:$0xff] %vm162_vm3, %v225_v0  ;;  %v65_v21 = vpop.permute.xlu1 %64  ;;  %v63_v22 = vpop.permute.xlu0 %62 }
  0x8f   :  { %169 = vst.msk [vmem:[%s626_s1 + $0x28] sm:$0x3] %vm165_vm5, %v225_v0  ;;  %166 = vst.msk [vmem:[%s626_s1 + $0x10] sm:$0x3] %vm165_vm5, %v225_v0 }
  0x90   :  { %108 = vst.msk [vmem:[%s626_s1 + $0x39] sm:$0xff] %vm102_vm1, %v65_v21  ;;  %107 = vst.msk [vmem:[%s626_s1 + $0x31] sm:$0xff] %vm102_vm1, %v63_v22 }
  0x91   :  { %122 = vst.msk [vmem:[%s626_s1 + $0x30] sm:$0x1] %vm119_vm0, %v63_v22 }
  0x92   :  { %146 = vst.msk [vmem:[%s626_s1 + $0x40] sm:$0x3] %vm139_vm4, %v225_v0  ;;  %v69_v23 = vpop.permute.xlu1 %68  ;;  %v67_v24 = vpop.permute.xlu0 %66 }
  0x93   :  { %144 = vst.msk [vmem:[%s626_s1 + $0x30] sm:$0xff] %vm136_vm2, %v225_v0  ;;  %145 = vst.msk [vmem:[%s626_s1 + $0x38] sm:$0xff] %vm136_vm2, %v225_v0 }
  0x94   :  { %172 = vst.msk [vmem:[%s626_s1 + $0x40] sm:$0x3] %vm165_vm5, %v225_v0 }
  0x95   :  { %170 = vst.msk [vmem:[%s626_s1 + $0x30] sm:$0xff] %vm162_vm3, %v225_v0  ;;  %171 = vst.msk [vmem:[%s626_s1 + $0x38] sm:$0xff] %vm162_vm3, %v225_v0 }
  0x96   :  { %110 = vst.msk [vmem:[%s626_s1 + $0x51] sm:$0xff] %vm102_vm1, %v69_v23  ;;  %109 = vst.msk [vmem:[%s626_s1 + $0x49] sm:$0xff] %vm102_vm1, %v67_v24  ;;  %v73_v25 = vpop.permute.xlu1 %72  ;;  %v71_v26 = vpop.permute.xlu0 %70 }
  0x97   :  { %123 = vst.msk [vmem:[%s626_s1 + $0x48] sm:$0x1] %vm119_vm0, %v67_v24  ;;  %124 = vst.msk [vmem:[%s626_s1 + $0x60] sm:$0x1] %vm119_vm0, %v71_v26 }
  0x98   :  { %149 = vst.msk [vmem:[%s626_s1 + $0x58] sm:$0x3] %vm139_vm4, %v225_v0 }
  0x99   :  { %147 = vst.msk [vmem:[%s626_s1 + $0x48] sm:$0xff] %vm136_vm2, %v225_v0  ;;  %148 = vst.msk [vmem:[%s626_s1 + $0x50] sm:$0xff] %vm136_vm2, %v225_v0 }
  0x9a   :  { %175 = vst.msk [vmem:[%s626_s1 + $0x58] sm:$0x3] %vm165_vm5, %v225_v0  ;;  %v77_v27 = vpop.permute.xlu1 %76  ;;  %v75_v28 = vpop.permute.xlu0 %74 }
  0x9b   :  { %173 = vst.msk [vmem:[%s626_s1 + $0x48] sm:$0xff] %vm162_vm3, %v225_v0  ;;  %174 = vst.msk [vmem:[%s626_s1 + $0x50] sm:$0xff] %vm162_vm3, %v225_v0 }
  0x9c   :  { %112 = vst.msk [vmem:[%s626_s1 + $0x69] sm:$0xff] %vm102_vm1, %v73_v25  ;;  %111 = vst.msk [vmem:[%s626_s1 + $0x61] sm:$0xff] %vm102_vm1, %v71_v26 }
  0x9d   :  { %152 = vst.msk [vmem:[%s626_s1 + $0x70] sm:$0x3] %vm139_vm4, %v225_v0 }
  0x9e   :  { %150 = vst.msk [vmem:[%s626_s1 + $0x60] sm:$0xff] %vm136_vm2, %v225_v0  ;;  %151 = vst.msk [vmem:[%s626_s1 + $0x68] sm:$0xff] %vm136_vm2, %v225_v0  ;;  %v81_v29 = vpop.permute.xlu1 %80  ;;  %v79_v30 = vpop.permute.xlu0 %78 }
  0x9f   :  { %178 = vst.msk [vmem:[%s626_s1 + $0x70] sm:$0x3] %vm165_vm5, %v225_v0 }
  0xa0   :  { %176 = vst.msk [vmem:[%s626_s1 + $0x60] sm:$0xff] %vm162_vm3, %v225_v0  ;;  %177 = vst.msk [vmem:[%s626_s1 + $0x68] sm:$0xff] %vm162_vm3, %v225_v0 }
  0xa1   :  { %114 = vst.msk [vmem:[%s626_s1 + $0x81] sm:$0xff] %vm102_vm1, %v77_v27  ;;  %113 = vst.msk [vmem:[%s626_s1 + $0x79] sm:$0xff] %vm102_vm1, %v75_v28 }
  0xa2   :  { %125 = vst.msk [vmem:[%s626_s1 + $0x78] sm:$0x1] %vm119_vm0, %v75_v28  ;;  %126 = vst.msk [vmem:[%s626_s1 + $0x90] sm:$0x1] %vm119_vm0, %v79_v30  ;;  %v85_v31 = vpop.permute.xlu1 %84  ;;  %v83_v32 = vpop.permute.xlu0 %82 }
  0xa3   :  { %155 = vst.msk [vmem:[%s626_s1 + $0x88] sm:$0x3] %vm139_vm4, %v225_v0 }
  0xa4   :  { %153 = vst.msk [vmem:[%s626_s1 + $0x78] sm:$0xff] %vm136_vm2, %v225_v0  ;;  %154 = vst.msk [vmem:[%s626_s1 + $0x80] sm:$0xff] %vm136_vm2, %v225_v0 }
  0xa5   :  { %181 = vst.msk [vmem:[%s626_s1 + $0x88] sm:$0x3] %vm165_vm5, %v225_v0 }
  0xa6   :  { %179 = vst.msk [vmem:[%s626_s1 + $0x78] sm:$0xff] %vm162_vm3, %v225_v0  ;;  %180 = vst.msk [vmem:[%s626_s1 + $0x80] sm:$0xff] %vm162_vm3, %v225_v0 }
  0xa7   :  { %116 = vst.msk [vmem:[%s626_s1 + $0x99] sm:$0xff] %vm102_vm1, %v81_v29  ;;  %115 = vst.msk [vmem:[%s626_s1 + $0x91] sm:$0xff] %vm102_vm1, %v79_v30 }
  0xa8   :  { %158 = vst.msk [vmem:[%s626_s1 + $0xa0] sm:$0x3] %vm139_vm4, %v225_v0 }
  0xa9   :  { %156 = vst.msk [vmem:[%s626_s1 + $0x90] sm:$0xff] %vm136_vm2, %v225_v0  ;;  %157 = vst.msk [vmem:[%s626_s1 + $0x98] sm:$0xff] %vm136_vm2, %v225_v0 }
  0xaa   :  { %184 = vst.msk [vmem:[%s626_s1 + $0xa0] sm:$0x3] %vm165_vm5, %v225_v0 }
  0xab   :  { %182 = vst.msk [vmem:[%s626_s1 + $0x90] sm:$0xff] %vm162_vm3, %v225_v0  ;;  %183 = vst.msk [vmem:[%s626_s1 + $0x98] sm:$0xff] %vm162_vm3, %v225_v0 }
  0xac   :  { %118 = vst.msk [vmem:[%s626_s1 + $0xb1] sm:$0xff] %vm102_vm1, %v85_v31  ;;  %117 = vst.msk [vmem:[%s626_s1 + $0xa9] sm:$0xff] %vm102_vm1, %v83_v32 }
  0xad   :  { %127 = vst.msk [vmem:[%s626_s1 + $0xa8] sm:$0x1] %vm119_vm0, %v83_v32 }
  0xae   :  { %161 = vst.msk [vmem:[%s626_s1 + $0xb8] sm:$0x3] %vm139_vm4, %v225_v0 }
  0xaf   :  { %159 = vst.msk [vmem:[%s626_s1 + $0xa8] sm:$0xff] %vm136_vm2, %v225_v0  ;;  %160 = vst.msk [vmem:[%s626_s1 + $0xb0] sm:$0xff] %vm136_vm2, %v225_v0 }
  0xb0   :  { %187 = vst.msk [vmem:[%s626_s1 + $0xb8] sm:$0x3] %vm165_vm5, %v225_v0 }
  0xb1   :  { %185 = vst.msk [vmem:[%s626_s1 + $0xa8] sm:$0xff] %vm162_vm3, %v225_v0  ;;  %186 = vst.msk [vmem:[%s626_s1 + $0xb0] sm:$0xff] %vm162_vm3, %v225_v0 }
  0xb2   :  { %192 = vsyncpa [#allocation3], 1 }

</bundles_post_ra>
